<compile_context>
chip_gen: v6e
topology: v6e:2x2x1
jax: 0.10.0
libtpu: 0.0.40
codegen_flags: <defaults>
</compile_context>

<pallas_src>
import jax
import jax.numpy as jnp
from jax.experimental import pallas as pl
from jax.experimental.pallas import tpu as pltpu


# ----------------------------------------------------------------------------
# Kernel
# ----------------------------------------------------------------------------
def _fcomb_kernel(x_ref, zc_ref, w0_ref, *refs):
    """Fused 1x1-conv chain on one NCHW-native (C, tile_cols) slab.

    x_ref : (1, C, tile_cols)  feature-map slab (channels=sublanes, spatial=lanes)
    zc_ref: (1, F, 1)          per-batch term  W0[C:]^T @ z + b0   (f32)
    w0_ref: (F, C)             feature-map half of the first conv weight
    refs  : (w1, b1, ..., wk, bk, out_ref); wi (F_out, F_in) f32, bi (F_out, 1) f32
    out   : (1, nc, tile_cols)
    """
    out_ref = refs[-1]
    wb = refs[:-1]
    n_rest = len(wb) // 2

    x = x_ref[0]                                              # (C, tile_cols)
    # Layer 0: concat([fm, z]) conv == W0[:C]^T @ fm + (W0[C:]^T @ z + b0)
    h = jnp.dot(w0_ref[...], x, preferred_element_type=jnp.float32)
    h = jnp.maximum(h + zc_ref[0], 0.0)                       # (F, tile_cols) f32

    for i in range(n_rest):
        w = wb[2 * i][...]                                    # (F_out, F_in) f32
        b = wb[2 * i + 1][...]                                # (F_out, 1)    f32
        h = jnp.dot(w, h, preferred_element_type=jnp.float32) + b
        if i < n_rest - 1:                                    # ReLU on all but last
            h = jnp.maximum(h, 0.0)
    out_ref[0] = h.astype(out_ref.dtype)


# ----------------------------------------------------------------------------
# Tiling / budgeting helpers
# ----------------------------------------------------------------------------
def _round_up(x, m):
    return ((x + m - 1) // m) * m


def _choose_tile_cols(hw, batch, cap):
    """Column-tile size (spatial positions per grid step).

    Lane-dense (multiple of 128) unless the spatial extent is smaller than one
    vreg row; keeps >= 4 total grid steps so each v7x TensorCore gets >= 2
    pipelined steps.
    """
    if hw <= 128:
        return hw                                   # full-extent block
    cap = max(128, (cap // 128) * 128)
    if hw % 128 == 0:
        tile = min(cap, hw)
    else:
        tile = min(cap, (hw // 128) * 128)          # ragged tail masked by Pallas
    while batch * pl.cdiv(hw, tile) < 4 and tile > 128:
        tile = max(128, ((tile // 2) // 128) * 128)
    return tile


def _block_vmem_bytes(block_shape, dtype):
    """Padded VMEM footprint of one block ((8,128) tiling, sublane packing)."""
    isz = jnp.dtype(dtype).itemsize
    sub = 8 * (4 // isz)
    dims = [int(d) for d in block_shape]
    if len(dims) == 1:
        dims = [1] + dims
    lead = 1
    for d in dims[:-2]:
        lead *= d
    return lead * _round_up(dims[-2], sub) * _round_up(dims[-1], 128) * isz


# ----------------------------------------------------------------------------
# Wrapper
# ----------------------------------------------------------------------------
def fcomb_forward(feature_map, z, weights, biases, *,
                  compute_dtype=jnp.bfloat16, max_tile_cols=2048):
    """feature_map: (B, C, H, W) NCHW (as in the PyTorch module), z: (B, L).

    compute_dtype: dtype used for the *streamed* feature-map slab and W0[:C]
      (the only large operands).  Hidden / last-layer weights stay f32
      resident and all accumulation / bias / ReLU happen in f32.
    """
    B, C, H, W = feature_map.shape
    F = weights[0].shape[1]                       # hidden width num_filters[0]
    nc = weights[-1].shape[1]                     # num_classes
    out_dtype = feature_map.dtype
    hw = H * W

    tile_cols = _choose_tile_cols(hw, B, max_tile_cols)
    n_col = pl.cdiv(hw, tile_cols)

    # ---- fold z-broadcast + concat into the first layer ---------------------
    w0 = weights[0]
    w0_fm = jnp.asarray(w0[:C, :].T, compute_dtype)                 # (F, C)
    z_contrib = (z.astype(jnp.float32) @ w0[C:, :].astype(jnp.float32)
                 + biases[0].astype(jnp.float32))                   # (B, F)
    z_contrib = z_contrib.reshape(B, F, 1)                          # f32

    # ---- remaining layers: tiny, VMEM-resident, kept in f32 ------------------
    rest_args = []
    for w, b in zip(weights[1:], biases[1:]):
        rest_args.append(jnp.asarray(w.T, jnp.float32))             # (F_out, F_in)
        rest_args.append(jnp.asarray(b, jnp.float32).reshape(-1, 1))  # (F_out, 1)

    # ---- NCHW-native input: free reshape, no transpose / pad passes ----------
    x = feature_map.reshape(B, C, hw).astype(compute_dtype)

    # ---- specs ---------------------------------------------------------------
    in_specs = [
        pl.BlockSpec((1, C, tile_cols), lambda b, j: (b, 0, j)),    # fm slab
        pl.BlockSpec((1, F, 1), lambda b, j: (b, 0, 0)),            # z term
        pl.BlockSpec(w0_fm.shape, lambda b, j: (0, 0)),             # W0[:C]^T
    ]
    for a in rest_args:
        in_specs.append(pl.BlockSpec(a.shape, lambda b, j: (0, 0)))  # resident
    out_spec = pl.BlockSpec((1, nc, tile_cols), lambda b, j: (b, 0, j))

    # ---- VMEM budget (lane/sublane padded); raise scoped limit only if needed
    vmem_est = (2 * _block_vmem_bytes((1, C, tile_cols), compute_dtype)
                + 2 * _block_vmem_bytes((1, nc, tile_cols), out_dtype)
                + 2 * _block_vmem_bytes((F, tile_cols), jnp.float32)   # live h + temp
                + 2 * (_block_vmem_bytes((1, F, 1), jnp.float32)
                       + _block_vmem_bytes(w0_fm.shape, compute_dtype)
                       + sum(_block_vmem_bytes(a.shape, a.dtype) for a in rest_args)))
    cp_kwargs = dict(dimension_semantics=("parallel", "parallel"))
    if vmem_est > (12 << 20):
        cp_kwargs["vmem_limit_bytes"] = min(int(vmem_est) + (4 << 20), 40 << 20)

    out_flat = pl.pallas_call(
        _fcomb_kernel,
        out_shape=jax.ShapeDtypeStruct((B, nc, hw), out_dtype),
        grid_spec=pltpu.PrefetchScalarGridSpec(
            num_scalar_prefetch=0,
            grid=(B, n_col),
            in_specs=in_specs,
            out_specs=out_spec,
        ),
        compiler_params=pltpu.CompilerParams(**cp_kwargs),
    )(x, z_contrib, w0_fm, *rest_args)

    # (B, nc, H*W) -> (B, nc, H, W): free reshape, already NCHW.
    return out_flat.reshape(B, nc, H, W)


# ----------------------------------------------------------------------------
# Parameters & reference
# ----------------------------------------------------------------------------
def make_fcomb_params(key, num_filters0, latent_dim, num_classes,
                      no_convs_fcomb, dtype=jnp.float32):
    """Deterministic synthetic init (stand-in for orthogonal/truncated-normal).

    Layer i weight stored as (in_ch, out_ch), matching x @ W in the reference.
    """
    dims = [num_filters0 + latent_dim]
    dims += [num_filters0] * (no_convs_fcomb - 1)
    dims += [num_classes]
    weights, biases = [], []
    for i in range(len(dims) - 1):
        key, kw, kb = jax.random.split(key, 3)
        fan_in = dims[i]
        w = (jax.random.normal(kw, (dims[i], dims[i + 1]), dtype)
             * (1.0 / jnp.sqrt(fan_in)))
        b = jax.random.normal(kb, (1, dims[i + 1]), dtype) * 0.01
        weights.append(w)
        biases.append(b)
    return weights, biases


def _reference_fcomb(feature_map, z, weights, biases):
    """Plain-JAX reference (original tile + concat formulation)."""
    B, C, H, W = feature_map.shape
    L = z.shape[1]
    z_b = jnp.broadcast_to(z[:, :, None, None], (B, L, H, W))
    x = jnp.concatenate([feature_map, z_b], axis=1)               # (B, C+L, H, W)
    h = jnp.transpose(x, (0, 2, 3, 1)).reshape(-1, C + L)
    for i, (w, b) in enumerate(zip(weights, biases)):
        h = h @ w + b
        if i < len(weights) - 1:
            h = jnp.maximum(h, 0.0)
    nc = weights[-1].shape[1]
    return jnp.transpose(h.reshape(B, H, W, nc), (0, 3, 1, 2))


# ----------------------------------------------------------------------------
# Self-test
# ----------------------------------------------------------------------------
if __name__ == "__main__":
    B, C, H, W = 2, 32, 16, 16
    latent_dim = 8
    num_classes = 4
    no_convs_fcomb = 4

    key = jax.random.PRNGKey(0)
    k_fm, k_z, k_p = jax.random.split(key, 3)
    feature_map = jax.random.normal(k_fm, (B, C, H, W), jnp.float32)
    z = jax.random.normal(k_z, (B, latent_dim), jnp.float32)
    weights, biases = make_fcomb_params(
        k_p, C, latent_dim, num_classes, no_convs_fcomb)

    ref = _reference_fcomb(feature_map, z, weights, biases)

    fwd = jax.jit(fcomb_forward,
                  static_argnames=("compute_dtype", "max_tile_cols"))

    # f32 streaming — strict correctness check.
    out_f32 = jax.block_until_ready(
        fwd(feature_map, z, weights, biases, compute_dtype=jnp.float32))
    assert out_f32.shape == (B, num_classes, H, W)
    assert jnp.allclose(out_f32, ref, atol=2e-4, rtol=2e-4)

    # bf16 streaming (default perf path, incl. v5e) — only layer 0 inputs are
    # bf16, hidden layers stay f32, so the tolerance is modest.
    out_bf16 = jax.block_until_ready(
        fwd(feature_map, z, weights, biases, compute_dtype=jnp.bfloat16))
    assert out_bf16.shape == (B, num_classes, H, W)
    assert jnp.allclose(out_bf16, ref, atol=1e-1, rtol=1e-1)

    print("KERNEL_OK")
</pallas_src>

<mosaic_0001>
module attributes {stable_mosaic.version = 11 : i64} {
  func.func @_fcomb_kernel(%arg0: i32, %arg1: i32, %arg2: memref<1x32x128xf32, #tpu.memory_space<vmem>>, %arg3: memref<1x32x1xf32, #tpu.memory_space<vmem>>, %arg4: memref<32x32xf32, #tpu.memory_space<vmem>>, %arg5: memref<32x32xf32, #tpu.memory_space<vmem>>, %arg6: memref<32x1xf32, #tpu.memory_space<vmem>>, %arg7: memref<32x32xf32, #tpu.memory_space<vmem>>, %arg8: memref<32x1xf32, #tpu.memory_space<vmem>>, %arg9: memref<4x32xf32, #tpu.memory_space<vmem>>, %arg10: memref<4x1xf32, #tpu.memory_space<vmem>>, %arg11: memref<1x4x128xf32, #tpu.memory_space<vmem>>) attributes {dimension_semantics = [#tpu.dimension_semantics<parallel>, #tpu.dimension_semantics<parallel>], iteration_bounds = array<i64: 2, 2>, scalar_prefetch = 0 : i64, scratch_operands = 0 : i64, tpu.core_type = #tpu.core_type<tc>, window_params = [{transform_indices = @transform_0, window_bounds = array<i64: 1, 32, 128>}, {transform_indices = @transform_1, window_bounds = array<i64: 1, 32, 1>}, {pipeline_mode = #tpu.pipeline_mode<synchronous>, transform_indices = @transform_2, window_bounds = array<i64: 32, 32>}, {pipeline_mode = #tpu.pipeline_mode<synchronous>, transform_indices = @transform_3, window_bounds = array<i64: 32, 32>}, {pipeline_mode = #tpu.pipeline_mode<synchronous>, transform_indices = @transform_4, window_bounds = array<i64: 32, 1>}, {pipeline_mode = #tpu.pipeline_mode<synchronous>, transform_indices = @transform_5, window_bounds = array<i64: 32, 32>}, {pipeline_mode = #tpu.pipeline_mode<synchronous>, transform_indices = @transform_6, window_bounds = array<i64: 32, 1>}, {pipeline_mode = #tpu.pipeline_mode<synchronous>, transform_indices = @transform_7, window_bounds = array<i64: 4, 32>}, {pipeline_mode = #tpu.pipeline_mode<synchronous>, transform_indices = @transform_8, window_bounds = array<i64: 4, 1>}, {transform_indices = @transform_9, window_bounds = array<i64: 1, 4, 128>}]} {
    %c0 = arith.constant 0 : index
    %c0_0 = arith.constant 0 : index
    %c0_1 = arith.constant 0 : index
    %0 = vector.load %arg2[%c0, %c0_0, %c0_1] : memref<1x32x128xf32, #tpu.memory_space<vmem>>, vector<1x32x128xf32>
    %1 = vector.shape_cast %0 : vector<1x32x128xf32> to vector<32x128xf32>
    %c0_2 = arith.constant 0 : index
    %c0_3 = arith.constant 0 : index
    %2 = vector.load %arg4[%c0_2, %c0_3] : memref<32x32xf32, #tpu.memory_space<vmem>>, vector<32x32xf32>
    %cst = arith.constant dense<0.000000e+00> : vector<32x128xf32>
    %3 = tpu.matmul %2, %1, %cst {dimension_numbers = #tpu.dot_dimension_numbers<[1], [0], [0], [1], [0, 0, 1, 1], [], []>} : vector<32x32xf32>, vector<32x128xf32>, vector<32x128xf32> -> vector<32x128xf32>
    %c0_4 = arith.constant 0 : index
    %c0_5 = arith.constant 0 : index
    %c0_6 = arith.constant 0 : index
    %4 = vector.load %arg3[%c0_4, %c0_5, %c0_6] : memref<1x32x1xf32, #tpu.memory_space<vmem>>, vector<1x32x1xf32>
    %5 = vector.shape_cast %4 : vector<1x32x1xf32> to vector<32x1xf32>
    %6 = vector.broadcast %5 : vector<32x1xf32> to vector<32x128xf32>
    %7 = arith.addf %3, %6 : vector<32x128xf32>
    %cst_7 = arith.constant 0.000000e+00 : f32
    %8 = vector.broadcast %cst_7 : f32 to vector<32x128xf32>
    %9 = arith.maximumf %7, %8 : vector<32x128xf32>
    %c0_8 = arith.constant 0 : index
    %c0_9 = arith.constant 0 : index
    %10 = vector.load %arg5[%c0_8, %c0_9] : memref<32x32xf32, #tpu.memory_space<vmem>>, vector<32x32xf32>
    %c0_10 = arith.constant 0 : index
    %c0_11 = arith.constant 0 : index
    %11 = vector.load %arg6[%c0_10, %c0_11] : memref<32x1xf32, #tpu.memory_space<vmem>>, vector<32x1xf32>
    %cst_12 = arith.constant dense<0.000000e+00> : vector<32x128xf32>
    %12 = tpu.matmul %10, %9, %cst_12 {dimension_numbers = #tpu.dot_dimension_numbers<[1], [0], [0], [1], [0, 0, 1, 1], [], []>} : vector<32x32xf32>, vector<32x128xf32>, vector<32x128xf32> -> vector<32x128xf32>
    %13 = vector.broadcast %11 : vector<32x1xf32> to vector<32x128xf32>
    %14 = arith.addf %12, %13 : vector<32x128xf32>
    %cst_13 = arith.constant 0.000000e+00 : f32
    %15 = vector.broadcast %cst_13 : f32 to vector<32x128xf32>
    %16 = arith.maximumf %14, %15 : vector<32x128xf32>
    %c0_14 = arith.constant 0 : index
    %c0_15 = arith.constant 0 : index
    %17 = vector.load %arg7[%c0_14, %c0_15] : memref<32x32xf32, #tpu.memory_space<vmem>>, vector<32x32xf32>
    %c0_16 = arith.constant 0 : index
    %c0_17 = arith.constant 0 : index
    %18 = vector.load %arg8[%c0_16, %c0_17] : memref<32x1xf32, #tpu.memory_space<vmem>>, vector<32x1xf32>
    %cst_18 = arith.constant dense<0.000000e+00> : vector<32x128xf32>
    %19 = tpu.matmul %17, %16, %cst_18 {dimension_numbers = #tpu.dot_dimension_numbers<[1], [0], [0], [1], [0, 0, 1, 1], [], []>} : vector<32x32xf32>, vector<32x128xf32>, vector<32x128xf32> -> vector<32x128xf32>
    %20 = vector.broadcast %18 : vector<32x1xf32> to vector<32x128xf32>
    %21 = arith.addf %19, %20 : vector<32x128xf32>
    %cst_19 = arith.constant 0.000000e+00 : f32
    %22 = vector.broadcast %cst_19 : f32 to vector<32x128xf32>
    %23 = arith.maximumf %21, %22 : vector<32x128xf32>
    %c0_20 = arith.constant 0 : index
    %c0_21 = arith.constant 0 : index
    %24 = vector.load %arg9[%c0_20, %c0_21] : memref<4x32xf32, #tpu.memory_space<vmem>>, vector<4x32xf32>
    %c0_22 = arith.constant 0 : index
    %c0_23 = arith.constant 0 : index
    %25 = vector.load %arg10[%c0_22, %c0_23] : memref<4x1xf32, #tpu.memory_space<vmem>>, vector<4x1xf32>
    %cst_24 = arith.constant dense<0.000000e+00> : vector<4x128xf32>
    %26 = tpu.matmul %24, %23, %cst_24 {dimension_numbers = #tpu.dot_dimension_numbers<[1], [0], [0], [1], [0, 0, 1, 1], [], []>} : vector<4x32xf32>, vector<32x128xf32>, vector<4x128xf32> -> vector<4x128xf32>
    %27 = vector.broadcast %25 : vector<4x1xf32> to vector<4x128xf32>
    %28 = arith.addf %26, %27 : vector<4x128xf32>
    %c0_25 = arith.constant 0 : index
    %c0_26 = arith.constant 0 : index
    %c0_27 = arith.constant 0 : index
    %29 = vector.load %arg11[%c0_25, %c0_26, %c0_27] : memref<1x4x128xf32, #tpu.memory_space<vmem>>, vector<1x4x128xf32>
    %30 = vector.shape_cast %29 : vector<1x4x128xf32> to vector<4x128xf32>
    %31 = vector.shape_cast %28 : vector<4x128xf32> to vector<1x4x128xf32>
    tpu.vector_store %arg11[%c0_25, %c0_26, %c0_27], %31 {strides = array<i32>} : memref<1x4x128xf32, #tpu.memory_space<vmem>>, vector<1x4x128xf32>,
    return
  }
  func.func @transform_0(%arg0: i32, %arg1: i32) -> (i32, i32, i32) {
    %c0_i32 = arith.constant 0 : i32
    %c0_i32_0 = arith.constant 0 : i32
    return %arg0, %c0_i32, %arg1 : i32, i32, i32
  }
  func.func @transform_1(%arg0: i32, %arg1: i32) -> (i32, i32, i32) {
    %c0_i32 = arith.constant 0 : i32
    %c0_i32_0 = arith.constant 0 : i32
    %c0_i32_1 = arith.constant 0 : i32
    return %arg0, %c0_i32, %c0_i32_0 : i32, i32, i32
  }
  func.func @transform_2(%arg0: i32, %arg1: i32) -> (i32, i32) {
    %c0_i32 = arith.constant 0 : i32
    %c0_i32_0 = arith.constant 0 : i32
    %c0_i32_1 = arith.constant 0 : i32
    return %c0_i32, %c0_i32_0 : i32, i32
  }
  func.func @transform_3(%arg0: i32, %arg1: i32) -> (i32, i32) {
    %c0_i32 = arith.constant 0 : i32
    %c0_i32_0 = arith.constant 0 : i32
    %c0_i32_1 = arith.constant 0 : i32
    return %c0_i32, %c0_i32_0 : i32, i32
  }
  func.func @transform_4(%arg0: i32, %arg1: i32) -> (i32, i32) {
    %c0_i32 = arith.constant 0 : i32
    %c0_i32_0 = arith.constant 0 : i32
    %c0_i32_1 = arith.constant 0 : i32
    return %c0_i32, %c0_i32_0 : i32, i32
  }
  func.func @transform_5(%arg0: i32, %arg1: i32) -> (i32, i32) {
    %c0_i32 = arith.constant 0 : i32
    %c0_i32_0 = arith.constant 0 : i32
    %c0_i32_1 = arith.constant 0 : i32
    return %c0_i32, %c0_i32_0 : i32, i32
  }
  func.func @transform_6(%arg0: i32, %arg1: i32) -> (i32, i32) {
    %c0_i32 = arith.constant 0 : i32
    %c0_i32_0 = arith.constant 0 : i32
    %c0_i32_1 = arith.constant 0 : i32
    return %c0_i32, %c0_i32_0 : i32, i32
  }
  func.func @transform_7(%arg0: i32, %arg1: i32) -> (i32, i32) {
    %c0_i32 = arith.constant 0 : i32
    %c0_i32_0 = arith.constant 0 : i32
    %c0_i32_1 = arith.constant 0 : i32
    return %c0_i32, %c0_i32_0 : i32, i32
  }
  func.func @transform_8(%arg0: i32, %arg1: i32) -> (i32, i32) {
    %c0_i32 = arith.constant 0 : i32
    %c0_i32_0 = arith.constant 0 : i32
    %c0_i32_1 = arith.constant 0 : i32
    return %c0_i32, %c0_i32_0 : i32, i32
  }
  func.func @transform_9(%arg0: i32, %arg1: i32) -> (i32, i32, i32) {
    %c0_i32 = arith.constant 0 : i32
    %c0_i32_0 = arith.constant 0 : i32
    return %arg0, %c0_i32, %arg1 : i32, i32, i32
  }
}

</mosaic_0001>

<bundles_post_ra>
// kernel: fcomb_forward.1
= control target key start
LH: loop header
LB: loop body
LE: loop exit
PB: predicated region body
PF: predicated region fallthrough
CT: control target
= control target key end

     0   :  { %s1278_s30 = smov 0   ;;  %s1280_s10 = smov 0   ;;  %s1455_s0 = inlined_call_operand.vmem [shape: f32[2,32,256], index: 0, kind: input, shape index: {}]   ;;  %s1456_s1 = inlined_call_operand.vmem [shape: f32[2,32,1], index: 1, kind: input, shape index: {}]   ;;  %s1457_s2 = inlined_call_operand.vmem [shape: f32[32,32], index: 2, kind: input, shape index: {}]   ;;  %s1458_s3 = inlined_call_operand.vmem [shape: f32[32,32], index: 3, kind: input, shape index: {}]   ;;  %s1459_s4 = inlined_call_operand.vmem [shape: f32[32,1], index: 4, kind: input, shape index: {}]   ;;  %s1460_s5 = inlined_call_operand.vmem [shape: f32[32,32], index: 5, kind: input, shape index: {}]   ;;  %s1461_s6 = inlined_call_operand.vmem [shape: f32[32,1], index: 6, kind: input, shape index: {}]   ;;  %s1462_s7 = inlined_call_operand.vmem [shape: f32[4,32], index: 7, kind: input, shape index: {}]   ;;  %s1463_s8 = inlined_call_operand.vmem [shape: f32[4,1], index: 8, kind: input, shape index: {}]   ;;  %s1464_s9 = inlined_call_operand.vmem [shape: f32[2,4,256], index: 9, kind: output, shape index: {}]  }
   0x1   :  { %s1282_s11 = smov 0   ;;  %s1284_s12 = smov 0  }
   0x2   :  { %s1286_s13 = smov 0   ;;  %s1288_s14 = smov 0  }
   0x3   :  { %s1290_s15 = smov 0  }
   0x4 LB: > { %s28_s16 = sadd.s32 1, %s1215_s13  ;;  %s31_s17 = sadd.s32 1, %s1219_s14  ;;  %s1223_s15 = sphi %s1290_s15, %s19_s15   ;;  %s1219_s14 = sphi %s1288_s14, %s1470_s14   ;;  %s1215_s13 = sphi %s1286_s13, %s1469_s13   ;;  %s1211_s12 = sphi %s1284_s12, %s1468_s12   ;;  %s1207_s11 = sphi %s1282_s11, %s1467_s11   ;;  %s1203_s10 = sphi %s1280_s10, %s1466_s10   ;;  %s1199_s30 = sphi %s1278_s30, %s1465_s30  }
   0x5   : > { %p29_p0 = scmp.ge.s32.totalorder %s28_s16, 2  ;;  %p47_p1 = scmp.ne.s32.totalorder %s1203_s10, %s1199_s30 }
   0x6   : > { %p48_p2 = scmp.eq.s32.totalorder %s1223_s15, 0  ;;  %s40_s21 = sadd.s32 1, %s1203_s10 }
   0x7   : > { %s1472_s16 = smov (%p29_p0, %s28_s16), 0  ;;  %s1474_s17 = smov (!%p29_p0, %s31_s17), %s1219_s14 }
   0x8   : > { %p49_p3 = por %p48_p2, %p47_p1  ;;  %p33_p4 = scmp.ge.s32.totalorder %s1474_s17, 2 }
   0x9   : > { %s36_s18 = ssub.s32 %s1215_s13, %s1472_s16  ;;  %p1000_p6 = scmp.ge.s32.totalorder %s1223_s15, 4 }
   0xa   : > { %s1476_s17 = smov (%p33_p4, %s1474_s17), 0 }
   0xb   : > { %s35_s19 = ssub.s32 %s1219_s14, %s1476_s17  ;;  %295 = sbr.rel (%p1000_p6) target bundleno = 24 (0x18), region = 44 }
   0xc   : > { %s37_s20 = sor.u32 %s36_s18, %s35_s19 }
   0xd   : > { %p38_p5 = scmp.eq.s32.totalorder %s37_s20, 0 }
   0xf   : > { %s1329_s22 = scalar_select %p38_p5, %s1203_s10, %s40_s21  }
  0x10   : > { %298 = sbr.rel (!%p49_p3) target bundleno = 24 (0x18), region = 48  ;;  %s300_s23 = sand.u32 (%p49_p3), 1, %s1203_s10  }
  0x11   : > { %s1002_s24 = sshll.u32 (%p49_p3), %s1219_s14, 3  ;;  %s1001_s25 = sshll.u32 (%p49_p3), %s300_s23, 5 }
  0x12   : > { %s304_s26 = sadd.s32 (%p49_p3), %s1215_s13, %s1002_s24  ;;  %s302_s19 = scalar_lea.vmem (%p49_p3), [#allocation2], %s1001_s25 }
  0x13   : > { %s1003_s27 = sshll.u32 (%p49_p3), %s304_s26, 3 }
  0x14   : > { %s306_s18 = scalar_lea.vmem (%p49_p3), %s1455_s0, %s1003_s27 }
  0x15   : > { %v341_v0 = vld [vmem:[%s306_s18] sm:$0xff]  ;;  %v343_v1 = vld [vmem:[%s306_s18 + $0x10] sm:$0xff] }
  0x16   : > { %v345_v2 = vld [vmem:[%s306_s18 + $0x20] sm:$0xff]  ;;  %342 = vst [vmem:[%s302_s19] sm:$0xff] %v341_v0  ;;  %344 = vst [vmem:[%s302_s19 + $0x8] sm:$0xff] %v343_v1  ;;  %v347_v3 = vld [vmem:[%s306_s18 + $0x30] sm:$0xff] }
  0x17   : > { %346 = vst [vmem:[%s302_s19 + $0x10] sm:$0xff] %v345_v2  ;;  %348 = vst [vmem:[%s302_s19 + $0x18] sm:$0xff] %v347_v3 }
  0x18 PF: > { %p1004_p7 = scmp.ge.s32.totalorder %s1223_s15, 1  ;;  %p361_p8 = scmp.lt.s32.totalorder %s1223_s15, 5 }
  0x1a   : > { %p362_p9 = pnand %p1004_p7, %p361_p8 }
  0x1b   : > { %s368_s20 = sand.u32 (!%p362_p9), 1, %s1199_s30   ;;  %p411_p10 = scmp.lt.s32.totalorder (!%p362_p9), %s1211_s12, 1 }
  0x1c   : > { %365 = sbr.rel (%p362_p9) target bundleno = 865 (0x361), region = 90  ;;  %s1005_s24 = sshll.u32 (!%p362_p9), %s368_s20, 5 }
  0x1d   : > { %s370_s25 = scalar_lea.vmem (!%p362_p9), [#allocation2], %s1005_s24  ;;  %p418_p11 = scmp.lt.s32.totalorder (!%p362_p9), %s1207_s11, 1 }
  0x21   : > { %v428_v4 = vld [vmem:[%s1457_s2] sm:$0xff]  ;;  %vm456_vm0 = vcmask 261120   ;;  %v1225_v5 = vmov 0   ;;  %v427_v6 = vld [vmem:[%s370_s25 + $0x18] sm:$0xff]  ;;  %v426_v7 = vld [vmem:[%s370_s25 + $0x10] sm:$0xff]  ;;  %s1478_s12 = smov (!%p411_p10, %s1211_s12), 1 }
  0x22   : > { %1063 = vmatprep.mubr.msk.f32.mxu0 %vm456_vm0, %v428_v4  ;;  %1167 = vset.pattern.permute.xlu0 %v1225_v5  ;;  %v425_v8 = vld [vmem:[%s370_s25 + $0x8] sm:$0xff]  ;;  %s1025_s30 = sshll.u32 %s1478_s12, 5  ;;  %v424_v9 = vld [vmem:[%s370_s25] sm:$0xff]  ;;  %v430_v14 = vld [vmem:[%s1457_s2 + $0x10] sm:$0xff]  ;;  %v1226_v2 = vmov 0.0   ;;  %vm1227_vm1 = vmmov 0  }
  0x23   : > { %1168 = vset.pattern.permute.xlu1 %v1225_v5  ;;  %1055 = vmatprep.subr.mxu0 %v427_v6  ;;  %s415_s28 = scalar_lea.vmem %s1456_s1, %s1025_s30  ;;  %v429_v12 = vld [vmem:[%s1457_s2 + $0x8] sm:$0xff]  ;;  %v431_v16 = vld [vmem:[%s1457_s2 + $0x18] sm:$0xff]  ;;  %v564_v18 = vld [vmem:[%s1459_s4 + $0x10] sm:$0xff]  ;;  %s1480_s11 = smov (!%p418_p11, %s1207_s11), 1 }
  0x24   : > { %1056 = vmatpush3.msra.mxu0 %v427_v6  ;;  %v435_v10 = vld [vmem:[%s415_s28 + $0x18] sm:$0xff]  ;;  %v433_v11 = vld [vmem:[%s415_s28 + $0x8] sm:$0xff]  ;;  %v434_v13 = vld [vmem:[%s415_s28 + $0x10] sm:$0xff]  ;;  %s1008_s24 = sshll.u32 %s1478_s12, 1 }
  0x25   : > { %1057 = vmatprep.subr.mxu0 %v426_v7  ;;  %453 = vperm.xlu0 %1167, %v435_v10   ;;  %v432_v15 = vld [vmem:[%s415_s28] sm:$0xff]  ;;  %v565_v17 = vld [vmem:[%s1459_s4 + $0x18] sm:$0xff]  ;;  %v563_v19 = vld [vmem:[%s1459_s4 + $0x8] sm:$0xff]  ;;  %s421_s25 = sadd.s32 %s1008_s24, %s1480_s11 }
  0x26   : > { %1058 = vmatpush3.msra.mxu0 %v426_v7  ;;  %443 = vperm.xlu1 %1168, %v433_v11   ;;  %v562_v20 = vld [vmem:[%s1459_s4] sm:$0xff]  ;;  %v694_v21 = vld [vmem:[%s1461_s6 + $0x18] sm:$0xff]  ;;  %v693_v22 = vld [vmem:[%s1461_s6 + $0x10] sm:$0xff]  ;;  %s1009_s30 = sshll.u32 %s421_s25, 2 }
  0x27   : > { %1059 = vmatprep.subr.mxu0 %v425_v8  ;;  %v692_v23 = vld [vmem:[%s1461_s6 + $0x8] sm:$0xff]  ;;  %v691_v24 = vld [vmem:[%s1461_s6] sm:$0xff]  ;;  %v560_v44 = vld [vmem:[%s1458_s3 + $0x10] sm:$0xff]  ;;  %s423_s28 = scalar_lea.vmem %s1464_s9, %s1009_s30 }
  0x28   : > { %1060 = vmatpush3.msra.mxu0 %v425_v8  ;;  %v817_v25 = vld [vmem:[%s1463_s8] sm:$0xf]  ;;  %v559_v43 = vld [vmem:[%s1458_s3 + $0x8] sm:$0xff]  ;;  %v561_v45 = vld [vmem:[%s1458_s3 + $0x18] sm:$0xff] }
  0x29   : > { %1061 = vmatprep.subr.mxu0 %v424_v9  ;;  %448 = vperm.xlu0 %1167, %v434_v13   ;;  %v558_v26 = vld [vmem:[%s1458_s3] sm:$0xff]  ;;  %v688_v63 = vld [vmem:[%s1460_s5 + $0x8] sm:$0xff]  ;;  %v689_v0 = vld [vmem:[%s1460_s5 + $0x10] sm:$0xff] }
  0x2a   : > { %1062 = vmatpush3.msra.mxu0 %v424_v9  ;;  %438 = vperm.xlu1 %1168, %v432_v15   ;;  %v687_v46 = vld [vmem:[%s1460_s5] sm:$0xff]  ;;  %v690_v1 = vld [vmem:[%s1460_s5 + $0x18] sm:$0xff] }
  0x2b   : > { %1064 = vmatmul.mubr.msk.f32.vlgmr.msra.gmra.mxu0 %vm456_vm0, %v429_v12  ;;  %1077 = vmatprep.mubr.msk.f32.mxu1 %vm456_vm0, %v558_v26 }
  0x2c   : > { %1066 = vmatprep.mubr.msk.f32.mxu0 %vm456_vm0, %v430_v14 }
  0x2d   : > { %583 = vperm.xlu0 %1167, %v565_v17  }
  0x2e   : > { %578 = vperm.xlu1 %1168, %v564_v18  }
  0x2f   : > { %1067 = vmatmul.mubr.msk.f32.gmra.mxu0 %vm456_vm0, %v431_v16 }
  0x30   : > { %1091 = vmatprep.mubr.msk.f32.mxu0 %vm456_vm0, %v687_v46 }
  0x31   : > { %573 = vperm.xlu0 %1167, %v563_v19   ;;  %v816_v19 = vld [vmem:[%s1462_s7] sm:$0xf] }
  0x32   : > { %568 = vperm.xlu1 %1168, %v562_v20  }
  0x35   : > { %712 = vperm.xlu0 %1167, %v694_v21  }
  0x36   : > { %707 = vperm.xlu1 %1168, %v693_v22  }
  0x39   : > { %702 = vperm.xlu0 %1167, %v692_v23  }
  0x3a   : > { %697 = vperm.xlu1 %1168, %v691_v24  }
  0x3d   : > { %820 = vperm.xlu0 %1167, %v817_v25  }
  0xa0   : > { %v454_v27 = vpop.permute.xlu0 %453 }
  0xa1   : > { %v444_v29 = vpop.permute.xlu1 %443 }
  0xa4   : > { %v449_v33 = vpop.permute.xlu0 %448 }
  0xa5   : > { %v439_v38 = vpop.permute.xlu1 %438 }
  0xa8   : > { %v584_v47 = vpop.permute.xlu0 %583 }
  0xa9   : > { %v579_v49 = vpop.permute.xlu1 %578 }
  0xac   : > { %v574_v53 = vpop.permute.xlu0 %573 }
  0xad   : > { %v569_v58 = vpop.permute.xlu1 %568 }
  0xb0   : > { %v713_v3 = vpop.permute.xlu0 %712 }
  0xb1   : > { %v708_v5 = vpop.permute.xlu1 %707 }
  0xb4   : > { %v703_v9 = vpop.permute.xlu0 %702 }
  0xb5   : > { %v698_v14 = vpop.permute.xlu1 %697 }
  0xb8   : > { %v821_v20 = vpop.permute.xlu0 %820 }
  0xeb   : > { %v1065_v28 = vpop.f32.mrf.mxu0 }
  0xec   : > { %v541_v35 = vadd.f32 %v1065_v28, %v444_v29 }
  0xed   : > { %v535_v30 = vpop.f32.mrf.mxu0 }
  0xee   : > { %v536_v39 = vadd.f32 %v535_v30, %v439_v38  ;;  %v555_v41 = vmax.f32 %v541_v35, 0.0 }
  0xef   : > { %v1068_v31 = vpop.f32.mrf.mxu0 }
  0xf0   : > { %v551_v32 = vadd.f32 %v1068_v31, %v454_v27  ;;  %v554_v42 = vmax.f32 %v536_v39, 0.0 }
  0xf1   : > { %v545_v34 = vpop.f32.mrf.mxu0 }
  0xf2   : > { %v557_v36 = vmax.f32 %v551_v32, 0.0  ;;  %v546_v37 = vadd.f32 %v545_v34, %v449_v33 }
  0xf4   : > { %v556_v40 = vmax.f32 %v546_v37, 0.0  ;;  %1069 = vmatprep.subr.mxu1 %v557_v36 }
  0xf5   : > { %1070 = vmatpush3.msra.mxu1 %v557_v36 }
  0xf6   : > { %1071 = vmatprep.subr.mxu1 %v556_v40 }
  0xf7   : > { %1072 = vmatpush3.msra.mxu1 %v556_v40 }
  0xf8   : > { %1073 = vmatprep.subr.mxu1 %v555_v41 }
  0xf9   : > { %1074 = vmatpush3.msra.mxu1 %v555_v41 }
  0xfa   : > { %1075 = vmatprep.subr.mxu1 %v554_v42 }
  0xfb   : > { %1076 = vmatpush3.msra.mxu1 %v554_v42 }
  0xfc   : > { %1078 = vmatmul.mubr.msk.f32.vlgmr.msra.gmra.mxu1 %vm456_vm0, %v559_v43  ;;  %1097 = vmatprep.subr.mxu1 %v1226_v2 }
  0xfd   : > { %1080 = vmatprep.mubr.msk.f32.mxu1 %vm456_vm0, %v560_v44 }
 0x100   : > { %1081 = vmatmul.mubr.msk.f32.gmra.mxu1 %vm456_vm0, %v561_v45 }
 0x101   : > { %1105 = vmatprep.mubr.msk.f32.mxu1 %vm1227_vm1, %v1226_v2 }
 0x1bc   : > { %v1079_v48 = vpop.f32.mrf.mxu1 }
 0x1bd   : > { %v670_v55 = vadd.f32 %v1079_v48, %v574_v53 }
 0x1be   : > { %v664_v50 = vpop.f32.mrf.mxu1 }
 0x1bf   : > { %v665_v59 = vadd.f32 %v664_v50, %v569_v58  ;;  %v684_v61 = vmax.f32 %v670_v55, 0.0 }
 0x1c0   : > { %v1082_v51 = vpop.f32.mrf.mxu1 }
 0x1c1   : > { %v680_v52 = vadd.f32 %v1082_v51, %v584_v47  ;;  %v683_v62 = vmax.f32 %v665_v59, 0.0 }
 0x1c2   : > { %v674_v54 = vpop.f32.mrf.mxu1 }
 0x1c3   : > { %v686_v56 = vmax.f32 %v680_v52, 0.0  ;;  %v675_v57 = vadd.f32 %v674_v54, %v579_v49 }
 0x1c5   : > { %v685_v60 = vmax.f32 %v675_v57, 0.0  ;;  %1083 = vmatprep.subr.mxu0 %v686_v56 }
 0x1c6   : > { %1084 = vmatpush3.msra.mxu0 %v686_v56 }
 0x1c7   : > { %1085 = vmatprep.subr.mxu0 %v685_v60 }
 0x1c8   : > { %1086 = vmatpush3.msra.mxu0 %v685_v60 }
 0x1c9   : > { %1087 = vmatprep.subr.mxu0 %v684_v61 }
 0x1ca   : > { %1088 = vmatpush3.msra.mxu0 %v684_v61 }
 0x1cb   : > { %1089 = vmatprep.subr.mxu0 %v683_v62 }
 0x1cc   : > { %1090 = vmatpush3.msra.mxu0 %v683_v62 }
 0x1cd   : > { %1092 = vmatmul.mubr.msk.f32.vlgmr.msra.gmra.mxu0 %vm456_vm0, %v688_v63 }
 0x1ce   : > { %1094 = vmatprep.mubr.msk.f32.mxu0 %vm456_vm0, %v689_v0 }
 0x1d1   : > { %1095 = vmatmul.mubr.msk.f32.gmra.mxu0 %vm456_vm0, %v690_v1 }
 0x28d   : > { %v1093_v4 = vpop.f32.mrf.mxu0 }
 0x28e   : > { %v799_v11 = vadd.f32 %v1093_v4, %v703_v9 }
 0x28f   : > { %v793_v6 = vpop.f32.mrf.mxu0 }
 0x290   : > { %v794_v15 = vadd.f32 %v793_v6, %v698_v14  ;;  %v813_v17 = vmax.f32 %v799_v11, 0.0 }
 0x291   : > { %v1096_v7 = vpop.f32.mrf.mxu0 }
 0x292   : > { %v809_v8 = vadd.f32 %v1096_v7, %v713_v3  ;;  %v812_v18 = vmax.f32 %v794_v15, 0.0 }
 0x293   : > { %v803_v10 = vpop.f32.mrf.mxu0 }
 0x294   : > { %v815_v12 = vmax.f32 %v809_v8, 0.0  ;;  %v804_v13 = vadd.f32 %v803_v10, %v708_v5 }
 0x296   : > { %v814_v16 = vmax.f32 %v804_v13, 0.0  ;;  %1098 = vmatpush3.msra.mxu1 %v815_v12 }
 0x297   : > { %1099 = vmatprep.subr.mxu1 %v1226_v2 }
 0x298   : > { %1100 = vmatpush3.msra.mxu1 %v814_v16 }
 0x299   : > { %1101 = vmatprep.subr.mxu1 %v1226_v2 }
 0x29a   : > { %1102 = vmatpush3.msra.mxu1 %v813_v17 }
 0x29b   : > { %1103 = vmatprep.subr.mxu1 %v1226_v2 }
 0x29c   : > { %1104 = vmatpush3.msra.mxu1 %v812_v18 }
 0x29d   : > { %1106 = vmatmul.mubr.msk.f32.vlgmr.msra.gmra.mxu1 %vm456_vm0, %v816_v19 }
 0x35d   : > { %v892_v21 = vpop.f32.mrf.mxu1 }
 0x35e   : > { %v893_v22 = vadd.f32 %v892_v21, %v821_v20 }
 0x35f   : > { %v1107_v23 = vpop.f32.mrf.mxu1 }
 0x360   : > { %896 = vst [vmem:[%s423_s28] sm:$0xf] %v893_v22 }
 0x361 PF: > { %s19_s15 = sadd.s32 1, %s1223_s15   ;;  %s1465_s30 = smov %s1203_s10 }
 0x362   : > { %p16_p12 = scmp.ge.s32.totalorder %s19_s15, 6   ;;  %s1466_s10 = smov %s1329_s22 }
 0x363   : > { %s1467_s11 = smov %s1215_s13  ;;  %s1468_s12 = smov %s1219_s14 }
 0x364   : > { %s1469_s13 = smov %s1472_s16  ;;  %s1470_s14 = smov %s1476_s17 }
 0x365   :  { %18 = sbr.rel (!%p16_p12) target bundleno = 4 (0x4), region = 132 }

</bundles_post_ra>
